<compile_context>
chip_gen: v7x
topology: tpu7x:2x2x1
jax: 0.10.0
libtpu: 0.0.40
codegen_flags: <defaults>
</compile_context>

<pallas_src>
import jax
import jax.numpy as jnp
from jax.experimental import pallas as pl
from jax.experimental.pallas import tpu as pltpu

LANE = 128


def _round_up(v, m):
    return ((v + m - 1) // m) * m


def hdnet_kernel(x_ref, w1t_ref, b1_ref, wout_ref, out_ref):
    # x:    (TB, D)    input tile (f32 or bf16)
    # w1t:  (D, Hp)    W1^T, hidden axis zero-padded to Hp lanes
    # b1:   (1, Hp)    bias (f32), zero-padded
    # wout: (Hp, D)    folded output weight (permute + negate + w2 scale)
    # out:  (TB, D)    f32 output tile (only real columns; no lane padding in HBM)
    z = jnp.dot(x_ref[...], w1t_ref[...],
                preferred_element_type=jnp.float32) + b1_ref[...]     # (TB, Hp) f32
    h = jnp.tanh(z)                                                   # EUP slot
    g = (1.0 - h * h).astype(wout_ref.dtype)                          # (TB, Hp)
    out_ref[...] = jnp.dot(g, wout_ref[...],
                           preferred_element_type=jnp.float32)        # (TB, D)


def prepare_hdnet_params(w1, b1, w2, *, use_bf16=False):
    """One-time weight preparation (fold symplectic structure, pad, cast).

    Run this once per set of hnet weights, NOT per forward call.
    """
    H, D = w1.shape
    d = D // 2
    # Fold symplectic permutation, negation and w2 scaling into one weight.
    w_out = w2[:, None] * jnp.concatenate([w1[:, d:], -w1[:, :d]], axis=1)  # (H, D)

    # Zero-pad the hidden axis to the 128-lane width so z/h/g are lane-dense.
    Hp = max(LANE, _round_up(H, LANE))
    w1t_p = jnp.zeros((D, Hp), jnp.float32).at[:, :H].set(jnp.transpose(w1))
    b1_p = jnp.zeros((1, Hp), jnp.float32).at[:, :H].set(b1)
    wout_p = jnp.zeros((Hp, D), jnp.float32).at[:H, :].set(w_out)

    op_dtype = jnp.bfloat16 if use_bf16 else jnp.float32
    return {
        "w1t": w1t_p.astype(op_dtype),   # MXU operand dtype
        "b1": b1_p,                      # bias add stays f32
        "wout": wout_p.astype(op_dtype),
    }


def hdnet_forward(t, x, params, *, max_tb=2048):
    """Pallas HDNet forward. `t` is accepted for API fidelity but unused (as in PyTorch)."""
    del t
    w1t, b1p, wout = params["w1t"], params["b1"], params["wout"]
    B, D = x.shape
    Hp = w1t.shape[1]
    op_dtype = w1t.dtype
    # bf16 tiles need a 16-row sublane multiple; f32 needs 8.
    align = 16 if op_dtype == jnp.bfloat16 else 8

    # --- batch tiling --------------------------------------------------------
    # Small batches: one grid step (no per-step overhead). Large batches:
    # 512-2048-row tiles, with an EVEN step count so v7x's two TensorCores
    # split the "parallel" grid axis evenly.
    Bp_min = _round_up(B, align)
    if Bp_min <= max_tb:
        TB, n_steps = Bp_min, 1
    else:
        n_steps = -(-Bp_min // max_tb)
        if n_steps % 2:
            n_steps += 1
        TB = _round_up(-(-B // n_steps), align)
    Bp = TB * n_steps

    xp = x.astype(op_dtype)
    if Bp != B:
        xp = jnp.zeros((Bp, D), op_dtype).at[:B].set(xp)

    out_p = pl.pallas_call(
        hdnet_kernel,
        out_shape=jax.ShapeDtypeStruct((Bp, D), jnp.float32),
        grid=(n_steps,),
        in_specs=[
            pl.BlockSpec((TB, D), lambda i: (i, 0)),    # x: batch-tiled
            pl.BlockSpec((D, Hp), lambda i: (0, 0)),    # weights VMEM-resident
            pl.BlockSpec((1, Hp), lambda i: (0, 0)),
            pl.BlockSpec((Hp, D), lambda i: (0, 0)),
        ],
        out_specs=pl.BlockSpec((TB, D), lambda i: (i, 0)),   # only real columns
        compiler_params=pltpu.CompilerParams(
            dimension_semantics=("parallel",)),              # shard across TCs (v7x)
    )(xp, w1t, b1p, wout)

    # Strip batch padding only when it was added; no column slice needed.
    return out_p if Bp == B else out_p[:B]


def hdnet_reference(x, w1, b1, w2):
    """Pure-JAX reference (autodiff), mirroring the PyTorch autograd.grad path."""
    def H_sum(xx):
        h = jnp.tanh(xx @ w1.T + b1)
        return jnp.sum(h @ w2)        # second-layer bias is constant -> drops out
    dH = jax.grad(H_sum)(x)
    d = x.shape[1] // 2
    dq, dp = dH[:, :d], dH[:, d:]
    return jnp.concatenate([dp, -dq], axis=1)


if __name__ == "__main__":
    key = jax.random.PRNGKey(0)
    k_x, k_w1, k_b1, k_w2 = jax.random.split(key, 4)

    B = 300        # batch (not a tile multiple: exercises batch padding paths)
    d_half = 16    # q / p dim  -> state dim D = 32
    D = 2 * d_half
    HID = 32       # hnet hidden width

    # Deterministic synthetic parameters: Linear(D,HID) -> tanh -> Linear(HID,1)
    x = jax.random.normal(k_x, (B, D), dtype=jnp.float32)
    w1 = jax.random.normal(k_w1, (HID, D), dtype=jnp.float32) * 0.1
    b1 = jax.random.normal(k_b1, (HID,), dtype=jnp.float32) * 0.1
    w2 = jax.random.normal(k_w2, (HID,), dtype=jnp.float32) * 0.1
    # (second-layer bias b2 has zero gradient contribution; omitted)
    # TODO(synk): hnet is hard-coded as a 2-layer tanh MLP; an arbitrary wrapped
    # hnet (general autograd through a user module) has no generic Pallas form.

    t = jnp.float32(0.0)
    ref = hdnet_reference(x, w1, b1, w2)

    # --- f32 path: single grid step (B=300 -> TB=304, grid=(1,)) ------------
    params_f32 = prepare_hdnet_params(w1, b1, w2, use_bf16=False)
    out = jax.block_until_ready(hdnet_forward(t, x, params_f32))
    assert out.shape == (B, D)
    assert jnp.allclose(out, ref, atol=1e-5, rtol=1e-5), "f32 mismatch vs autodiff reference"

    # --- f32 path, forced multi-step even grid (exercises tiling/padding) ----
    out_tiled = jax.block_until_ready(hdnet_forward(t, x, params_f32, max_tb=96))
    assert out_tiled.shape == (B, D)
    assert jnp.allclose(out_tiled, ref, atol=1e-5, rtol=1e-5), "tiled f32 mismatch"

    # --- bf16 operand path (production option; f32 accumulation) ------------
    params_bf16 = prepare_hdnet_params(w1, b1, w2, use_bf16=True)
    out_bf16 = jax.block_until_ready(hdnet_forward(t, x, params_bf16))
    assert out_bf16.shape == (B, D)
    assert jnp.allclose(out_bf16, ref, atol=2e-2, rtol=2e-2), "bf16 mismatch vs reference"

    print("KERNEL_OK")
</pallas_src>

<mosaic_0001>
module attributes {stable_mosaic.version = 11 : i64} {
  func.func @hdnet_kernel(%arg0: i32, %arg1: memref<304x32xf32, #tpu.memory_space<vmem>>, %arg2: memref<32x128xf32, #tpu.memory_space<vmem>>, %arg3: memref<1x128xf32, #tpu.memory_space<vmem>>, %arg4: memref<128x32xf32, #tpu.memory_space<vmem>>, %arg5: memref<304x32xf32, #tpu.memory_space<vmem>>) attributes {dimension_semantics = [#tpu.dimension_semantics<parallel>], iteration_bounds = array<i64: 1>, scalar_prefetch = 0 : i64, scratch_operands = 0 : i64, tpu.core_type = #tpu.core_type<tc>, window_params = [{transform_indices = @transform_0, window_bounds = array<i64: 304, 32>}, {pipeline_mode = #tpu.pipeline_mode<synchronous>, transform_indices = @transform_1, window_bounds = array<i64: 32, 128>}, {pipeline_mode = #tpu.pipeline_mode<synchronous>, transform_indices = @transform_2, window_bounds = array<i64: 1, 128>}, {pipeline_mode = #tpu.pipeline_mode<synchronous>, transform_indices = @transform_3, window_bounds = array<i64: 128, 32>}, {transform_indices = @transform_4, window_bounds = array<i64: 304, 32>}]} {
    %c0 = arith.constant 0 : index
    %c0_0 = arith.constant 0 : index
    %0 = vector.load %arg1[%c0, %c0_0] : memref<304x32xf32, #tpu.memory_space<vmem>>, vector<304x32xf32>
    %c0_1 = arith.constant 0 : index
    %c0_2 = arith.constant 0 : index
    %1 = vector.load %arg2[%c0_1, %c0_2] : memref<32x128xf32, #tpu.memory_space<vmem>>, vector<32x128xf32>
    %cst = arith.constant dense<0.000000e+00> : vector<304x128xf32>
    %2 = tpu.matmul %0, %1, %cst {dimension_numbers = #tpu.dot_dimension_numbers<[1], [0], [0], [1], [0, 0, 1, 1], [], []>} : vector<304x32xf32>, vector<32x128xf32>, vector<304x128xf32> -> vector<304x128xf32>
    %c0_3 = arith.constant 0 : index
    %c0_4 = arith.constant 0 : index
    %3 = vector.load %arg3[%c0_3, %c0_4] : memref<1x128xf32, #tpu.memory_space<vmem>>, vector<1x128xf32>
    %4 = vector.broadcast %3 : vector<1x128xf32> to vector<304x128xf32>
    %5 = arith.addf %2, %4 : vector<304x128xf32>
    %6 = math.tanh %5 : vector<304x128xf32>
    %7 = arith.mulf %6, %6 : vector<304x128xf32>
    %cst_5 = arith.constant 1.000000e+00 : f32
    %8 = vector.broadcast %cst_5 : f32 to vector<304x128xf32>
    %9 = arith.subf %8, %7 : vector<304x128xf32>
    %c0_6 = arith.constant 0 : index
    %c0_7 = arith.constant 0 : index
    %10 = vector.load %arg4[%c0_6, %c0_7] : memref<128x32xf32, #tpu.memory_space<vmem>>, vector<128x32xf32>
    %cst_8 = arith.constant dense<0.000000e+00> : vector<304x32xf32>
    %11 = tpu.matmul %9, %10, %cst_8 {dimension_numbers = #tpu.dot_dimension_numbers<[1], [0], [0], [1], [0, 0, 1, 1], [], []>} : vector<304x128xf32>, vector<128x32xf32>, vector<304x32xf32> -> vector<304x32xf32>
    %c0_9 = arith.constant 0 : index
    %c0_10 = arith.constant 0 : index
    %12 = vector.load %arg5[%c0_9, %c0_10] : memref<304x32xf32, #tpu.memory_space<vmem>>, vector<304x32xf32>
    tpu.vector_store %arg5[%c0_9, %c0_10], %11 {strides = array<i32>} : memref<304x32xf32, #tpu.memory_space<vmem>>, vector<304x32xf32>,
    return
  }
  func.func @transform_0(%arg0: i32) -> (i32, i32) {
    %c0_i32 = arith.constant 0 : i32
    %c0_i32_0 = arith.constant 0 : i32
    return %arg0, %c0_i32 : i32, i32
  }
  func.func @transform_1(%arg0: i32) -> (i32, i32) {
    %c0_i32 = arith.constant 0 : i32
    %c0_i32_0 = arith.constant 0 : i32
    %c0_i32_1 = arith.constant 0 : i32
    return %c0_i32, %c0_i32_0 : i32, i32
  }
  func.func @transform_2(%arg0: i32) -> (i32, i32) {
    %c0_i32 = arith.constant 0 : i32
    %c0_i32_0 = arith.constant 0 : i32
    %c0_i32_1 = arith.constant 0 : i32
    return %c0_i32, %c0_i32_0 : i32, i32
  }
  func.func @transform_3(%arg0: i32) -> (i32, i32) {
    %c0_i32 = arith.constant 0 : i32
    %c0_i32_0 = arith.constant 0 : i32
    %c0_i32_1 = arith.constant 0 : i32
    return %c0_i32, %c0_i32_0 : i32, i32
  }
  func.func @transform_4(%arg0: i32) -> (i32, i32) {
    %c0_i32 = arith.constant 0 : i32
    %c0_i32_0 = arith.constant 0 : i32
    return %arg0, %c0_i32 : i32, i32
  }
}

</mosaic_0001>

<bundles_post_ra>
// kernel: tpu_custom_call.1
= control target key start
LH: loop header
LB: loop body
LE: loop exit
PB: predicated region body
PF: predicated region fallthrough
CT: control target
= control target key end

     0   :  { %vm66_vm0 = vcmask 261120   ;;  %s1716_s1 = inlined_call_operand.vmem [shape: f32[32,128], index: 1, kind: input, shape index: {}]   ;;  %s1717_s0 = inlined_call_operand.vmem [shape: f32[304,32], index: 0, kind: input, shape index: {}]   ;;  %s1718_s3 = inlined_call_operand.vmem [shape: f32[128,32], index: 3, kind: input, shape index: {}]   ;;  %s1719_s2 = inlined_call_operand.vmem [shape: f32[1,128], index: 2, kind: input, shape index: {}]   ;;  %s1720_s4 = inlined_call_operand.vmem [shape: f32[304,32], index: 4, kind: output, shape index: {}]  }
   0x1   :  { %v55_v0 = vld [vmem:[%s1716_s1] sm:$0xff]  ;;  %v56_v1 = vld [vmem:[%s1716_s1 + $0x8] sm:$0xff]  ;;  %v57_v2 = vld [vmem:[%s1716_s1 + $0x10] sm:$0xff] }
   0x2   :  { %v1152_v3 = vpack.c.bf16 %v56_v1, %v55_v0  ;;  %v58_v4 = vld [vmem:[%s1716_s1 + $0x18] sm:$0xff]  ;;  %v17_v5 = vld [vmem:[%s1717_s0] sm:$0xff]  ;;  %v18_v7 = vld [vmem:[%s1717_s0 + $0x8] sm:$0xff] }
   0x3   :  { %v1156_v6 = vpack.c.bf16 %v58_v4, %v57_v2  ;;  %1006 = vmatprep.mubr.msk.f32.mxu0 %vm66_vm0, %v17_v5  ;;  %v19_v8 = vld [vmem:[%s1717_s0 + $0x10] sm:$0xff]  ;;  %v20_v9 = vld [vmem:[%s1717_s0 + $0x18] sm:$0xff]  ;;  %v21_v10 = vld [vmem:[%s1717_s0 + $0x20] sm:$0xff] }
   0x4   :  { %1153 = vmatprep.subr.bf16.mxu0 %v1152_v3  ;;  %v550_v11 = vld [vmem:[%s1718_s3] sm:$0xff]  ;;  %v551_v12 = vld [vmem:[%s1718_s3 + $0x8] sm:$0xff]  ;;  %v552_v13 = vld [vmem:[%s1718_s3 + $0x10] sm:$0xff] }
   0x5   :  { %1155 = vmatpush3.bf16.msra.mxu0 %v1152_v3  ;;  %v1160_v14 = vpack.c.bf16 %v551_v12, %v550_v11  ;;  %v553_v15 = vld [vmem:[%s1718_s3 + $0x18] sm:$0xff]  ;;  %v22_v16 = vld [vmem:[%s1717_s0 + $0x28] sm:$0xff]  ;;  %v554_v18 = vld [vmem:[%s1718_s3 + $0x20] sm:$0xff] }
   0x6   :  { %1157 = vmatprep.subr.bf16.mxu0 %v1156_v6  ;;  %v1164_v17 = vpack.c.bf16 %v553_v15, %v552_v13  ;;  %v555_v19 = vld [vmem:[%s1718_s3 + $0x28] sm:$0xff]  ;;  %v23_v20 = vld [vmem:[%s1717_s0 + $0x30] sm:$0xff]  ;;  %v24_v22 = vld [vmem:[%s1717_s0 + $0x38] sm:$0xff] }
   0x7   :  { %1192 = vmatprep.subr.bf16.mxu1 %v1160_v14  ;;  %v1168_v21 = vpack.c.bf16 %v555_v19, %v554_v18  ;;  %v25_v23 = vld [vmem:[%s1717_s0 + $0x40] sm:$0xff]  ;;  %v26_v24 = vld [vmem:[%s1717_s0 + $0x48] sm:$0xff]  ;;  %v27_v25 = vld [vmem:[%s1717_s0 + $0x50] sm:$0xff] }
   0x8   :  { %1200 = vmatpush3.bf16.msra.mxu1 %v1160_v14  ;;  %v28_v26 = vld [vmem:[%s1717_s0 + $0x58] sm:$0xff]  ;;  %v29_v27 = vld [vmem:[%s1717_s0 + $0x60] sm:$0xff]  ;;  %v30_v28 = vld [vmem:[%s1717_s0 + $0x68] sm:$0xff] }
   0x9   :  { %1159 = vmatpush3.bf16.msra.mxu0 %v1156_v6  ;;  %1193 = vmatprep.subr.bf16.mxu1 %v1164_v17  ;;  %v31_v29 = vld [vmem:[%s1717_s0 + $0x70] sm:$0xff]  ;;  %v32_v30 = vld [vmem:[%s1717_s0 + $0x78] sm:$0xff]  ;;  %v33_v31 = vld [vmem:[%s1717_s0 + $0x80] sm:$0xff] }
   0xa   :  { %1161 = vmatprep.subr.bf16.mxu0 %v1160_v14  ;;  %v34_v32 = vld [vmem:[%s1717_s0 + $0x88] sm:$0xff]  ;;  %v35_v33 = vld [vmem:[%s1717_s0 + $0x90] sm:$0xff]  ;;  %v36_v34 = vld [vmem:[%s1717_s0 + $0x98] sm:$0xff] }
   0xb   :  { %v37_v35 = vld [vmem:[%s1717_s0 + $0xa0] sm:$0xff]  ;;  %v38_v36 = vld [vmem:[%s1717_s0 + $0xa8] sm:$0xff]  ;;  %v39_v37 = vld [vmem:[%s1717_s0 + $0xb0] sm:$0xff] }
   0xc   :  { %1007 = vmatmul.mubr.msk.f32.vlgmr.msra.gmra.mrb[0].mxu0 %vm66_vm0, %v18_v7  ;;  %1201 = vmatpush3.bf16.msra.mxu1 %v1164_v17  ;;  %v40_v38 = vld [vmem:[%s1717_s0 + $0xb8] sm:$0xff]  ;;  %v41_v39 = vld [vmem:[%s1717_s0 + $0xc0] sm:$0xff]  ;;  %v42_v40 = vld [vmem:[%s1717_s0 + $0xc8] sm:$0xff] }
   0xd   :  { %1009 = vmatprep.mubr.msk.f32.mxu0 %vm66_vm0, %v19_v8  ;;  %1163 = vmatpush3.bf16.msra.mxu0 %v1160_v14  ;;  %v43_v41 = vld [vmem:[%s1717_s0 + $0xd0] sm:$0xff]  ;;  %v44_v42 = vld [vmem:[%s1717_s0 + $0xd8] sm:$0xff]  ;;  %v45_v43 = vld [vmem:[%s1717_s0 + $0xe0] sm:$0xff] }
   0xe   :  { %1165 = vmatprep.subr.bf16.mxu0 %v1164_v17  ;;  %1194 = vmatprep.subr.bf16.mxu1 %v1168_v21  ;;  %v46_v44 = vld [vmem:[%s1717_s0 + $0xe8] sm:$0xff]  ;;  %v47_v45 = vld [vmem:[%s1717_s0 + $0xf0] sm:$0xff]  ;;  %v48_v46 = vld [vmem:[%s1717_s0 + $0xf8] sm:$0xff] }
   0xf   :  { %v49_v47 = vld [vmem:[%s1717_s0 + $0x100] sm:$0xff]  ;;  %v50_v48 = vld [vmem:[%s1717_s0 + $0x108] sm:$0xff]  ;;  %v51_v49 = vld [vmem:[%s1717_s0 + $0x110] sm:$0xff] }
  0x10   :  { %1010 = vmatmul.mubr.msk.f32.gmra.mrb[2].mxu0 %vm66_vm0, %v20_v9  ;;  %1202 = vmatpush3.bf16.msra.mxu1 %v1168_v21  ;;  %v52_v50 = vld [vmem:[%s1717_s0 + $0x118] sm:$0xff]  ;;  %v53_v51 = vld [vmem:[%s1717_s0 + $0x120] sm:$0xff]  ;;  %v54_v52 = vld [vmem:[%s1717_s0 + $0x128] sm:$0xff] }
  0x11   :  { %1012 = vmatprep.mubr.msk.f32.mxu0 %vm66_vm0, %v21_v10  ;;  %1167 = vmatpush3.bf16.msra.mxu0 %v1164_v17  ;;  %v556_v53 = vld [vmem:[%s1718_s3 + $0x30] sm:$0xff]  ;;  %v557_v54 = vld [vmem:[%s1718_s3 + $0x38] sm:$0xff]  ;;  %v558_v56 = vld [vmem:[%s1718_s3 + $0x40] sm:$0xff] }
  0x12   :  { %1169 = vmatprep.subr.bf16.mxu0 %v1168_v21  ;;  %v1172_v55 = vpack.c.bf16 %v557_v54, %v556_v53  ;;  %v559_v57 = vld [vmem:[%s1718_s3 + $0x48] sm:$0xff]  ;;  %v560_v59 = vld [vmem:[%s1718_s3 + $0x50] sm:$0xff]  ;;  %v561_v60 = vld [vmem:[%s1718_s3 + $0x58] sm:$0xff] }
  0x13   :  { %v1176_v58 = vpack.c.bf16 %v559_v57, %v558_v56  ;;  %v1180_v61 = vpack.c.bf16 %v561_v60, %v560_v59  ;;  %v562_v62 = vld [vmem:[%s1718_s3 + $0x60] sm:$0xff]  ;;  %v563_v63 = vld [vmem:[%s1718_s3 + $0x68] sm:$0xff]  ;;  %v564_v1 = vld [vmem:[%s1718_s3 + $0x70] sm:$0xff] }
  0x14   :  { %1013 = vmatmul.mubr.msk.f32.gmra.mrb[4].mxu0 %vm66_vm0, %v22_v16  ;;  %1195 = vmatprep.subr.bf16.mxu1 %v1172_v55  ;;  %v1184_v0 = vpack.c.bf16 %v563_v63, %v562_v62  ;;  %v565_v2 = vld [vmem:[%s1718_s3 + $0x78] sm:$0xff]  ;;  %v1524_v4 = vld [vmem:[%s1719_s2] ss:$0 sm:$0xff] }
  0x15   :  { %1015 = vmatprep.mubr.msk.f32.mxu0 %vm66_vm0, %v23_v20  ;;  %1171 = vmatpush3.bf16.msra.mxu0 %v1168_v21  ;;  %v1188_v3 = vpack.c.bf16 %v565_v2, %v564_v1 }
  0x16   :  { %1173 = vmatprep.subr.bf16.mxu0 %v1172_v55  ;;  %1203 = vmatpush3.bf16.msra.mxu1 %v1172_v55 }
  0x17   :  { %1196 = vmatprep.subr.bf16.mxu1 %v1176_v58 }
  0x18   :  { %1016 = vmatmul.mubr.msk.f32.gmra.mrb[6].mxu0 %vm66_vm0, %v24_v22 }
  0x19   :  { %1018 = vmatprep.mubr.msk.f32.mxu0 %vm66_vm0, %v25_v23  ;;  %1175 = vmatpush3.bf16.msra.mxu0 %v1172_v55 }
  0x1a   :  { %1177 = vmatprep.subr.bf16.mxu0 %v1176_v58  ;;  %1204 = vmatpush3.bf16.msra.mxu1 %v1176_v58 }
  0x1b   :  { %1197 = vmatprep.subr.bf16.mxu1 %v1180_v61 }
  0x1c   :  { %1019 = vmatmul.mubr.msk.f32.gmra.mrb[8].mxu0 %vm66_vm0, %v26_v24 }
  0x1d   :  { %1021 = vmatprep.mubr.msk.f32.mxu0 %vm66_vm0, %v27_v25  ;;  %1179 = vmatpush3.bf16.msra.mxu0 %v1176_v58 }
  0x1e   :  { %1181 = vmatprep.subr.bf16.mxu0 %v1180_v61  ;;  %1205 = vmatpush3.bf16.msra.mxu1 %v1180_v61 }
  0x1f   :  { %1198 = vmatprep.subr.bf16.mxu1 %v1184_v0 }
  0x20   :  { %1022 = vmatmul.mubr.msk.f32.gmra.mrb[10].mxu0 %vm66_vm0, %v28_v26 }
  0x21   :  { %1024 = vmatprep.mubr.msk.f32.mxu0 %vm66_vm0, %v29_v27  ;;  %1183 = vmatpush3.bf16.msra.mxu0 %v1180_v61 }
  0x22   :  { %1185 = vmatprep.subr.bf16.mxu0 %v1184_v0  ;;  %1206 = vmatpush3.bf16.msra.mxu1 %v1184_v0 }
  0x23   :  { %1199 = vmatprep.subr.bf16.mxu1 %v1188_v3 }
  0x24   :  { %1025 = vmatmul.mubr.msk.f32.gmra.mrb[12].mxu0 %vm66_vm0, %v30_v28 }
  0x25   :  { %1027 = vmatprep.mubr.msk.f32.mxu0 %vm66_vm0, %v31_v29  ;;  %1187 = vmatpush3.bf16.msra.mxu0 %v1184_v0 }
  0x26   :  { %1189 = vmatprep.subr.bf16.mxu0 %v1188_v3  ;;  %1207 = vmatpush3.bf16.msra.mxu1 %v1188_v3 }
  0x28   :  { %1028 = vmatmul.mubr.msk.f32.gmra.mrb[14].mxu0 %vm66_vm0, %v32_v30 }
  0x29   :  { %1030 = vmatprep.mubr.msk.f32.mxu0 %vm66_vm0, %v33_v31  ;;  %1191 = vmatpush3.bf16.msra.mxu0 %v1188_v3 }
  0x2c   :  { %1031 = vmatmul.mubr.msk.f32.gmra.mrb[16].mxu0 %vm66_vm0, %v34_v32 }
  0x2d   :  { %1033 = vmatprep.mubr.msk.f32.mxu0 %vm66_vm0, %v35_v33 }
  0x30   :  { %1034 = vmatmul.mubr.msk.f32.gmra.mrb[18].mxu0 %vm66_vm0, %v36_v34 }
  0x31   :  { %1036 = vmatprep.mubr.msk.f32.mxu0 %vm66_vm0, %v37_v35 }
  0x34   :  { %1037 = vmatmul.mubr.msk.f32.gmra.mrb[20].mxu0 %vm66_vm0, %v38_v36 }
  0x35   :  { %1039 = vmatprep.mubr.msk.f32.mxu0 %vm66_vm0, %v39_v37 }
  0x38   :  { %1040 = vmatmul.mubr.msk.f32.gmra.mrb[22].mxu0 %vm66_vm0, %v40_v38 }
  0x39   :  { %1042 = vmatprep.mubr.msk.f32.mxu0 %vm66_vm0, %v41_v39 }
  0x3c   :  { %1043 = vmatmul.mubr.msk.f32.gmra.mrb[24].mxu0 %vm66_vm0, %v42_v40 }
  0x3d   :  { %1045 = vmatprep.mubr.msk.f32.mxu0 %vm66_vm0, %v43_v41 }
  0x40   :  { %1046 = vmatmul.mubr.msk.f32.gmra.mrb[26].mxu0 %vm66_vm0, %v44_v42 }
  0x41   :  { %1048 = vmatprep.mubr.msk.f32.mxu0 %vm66_vm0, %v45_v43 }
  0x44   :  { %1049 = vmatmul.mubr.msk.f32.gmra.mrb[28].mxu0 %vm66_vm0, %v46_v44 }
  0x45   :  { %1051 = vmatprep.mubr.msk.f32.mxu0 %vm66_vm0, %v47_v45 }
  0x48   :  { %1052 = vmatmul.mubr.msk.f32.gmra.mrb[30].mxu0 %vm66_vm0, %v48_v46 }
  0x49   :  { %1054 = vmatprep.mubr.msk.f32.mxu0 %vm66_vm0, %v49_v47 }
  0x4c   :  { %1055 = vmatmul.mubr.msk.f32.gmra.mrb[32].mxu0 %vm66_vm0, %v50_v48 }
  0x4d   :  { %1057 = vmatprep.mubr.msk.f32.mxu0 %vm66_vm0, %v51_v49 }
  0x50   :  { %1058 = vmatmul.mubr.msk.f32.gmra.mrb[34].mxu0 %vm66_vm0, %v52_v50 }
  0x51   :  { %1060 = vmatprep.mubr.msk.f32.mxu0 %vm66_vm0, %v53_v51 }
  0x54   :  { %1061 = vmatmul.mubr.msk.f32.gmra.mrb[36].mxu0 %vm66_vm0, %v54_v52 }
  0xdf   :  { %v1008_v5 = vpop.f32.mrb[0].mxu0 }
  0xe0   :  { %v253_v6 = vadd.f32 %v1008_v5, %v1524_v4  ;;  %v247_v7 = vpop.f32.mrb[1].mxu0 }
  0xe1   :  { %v248_v8 = vadd.f32 %v1524_v4, %v247_v7 }
  0xe2   :  { %1208 = vtanh.f32 %v253_v6 }
  0xe3   :  { %1210 = vtanh.f32 %v248_v8  ;;  %v1011_v9 = vpop.f32.mrb[2].mxu0 }
  0xe4   :  { %v263_v10 = vadd.f32 %v1011_v9, %v1524_v4  ;;  %v257_v11 = vpop.f32.mrb[3].mxu0 }
  0xe5   :  { %v258_v12 = vadd.f32 %v1524_v4, %v257_v11 }
  0xe6   :  { %1212 = vtanh.f32 %v263_v10 }
  0xe7   :  { %1214 = vtanh.f32 %v258_v12  ;;  %v1014_v13 = vpop.f32.mrb[4].mxu0 }
  0xe8   :  { %v273_v14 = vadd.f32 %v1014_v13, %v1524_v4  ;;  %v267_v15 = vpop.f32.mrb[5].mxu0 }
  0xe9   :  { %v268_v16 = vadd.f32 %v1524_v4, %v267_v15 }
  0xea   :  { %1216 = vtanh.f32 %v273_v14 }
  0xeb   :  { %1218 = vtanh.f32 %v268_v16  ;;  %v1017_v17 = vpop.f32.mrb[6].mxu0 }
  0xec   :  { %v1209_v18 = vpop.eup %1208  ;;  %v283_v19 = vadd.f32 %v1017_v17, %v1524_v4  ;;  %v277_v20 = vpop.f32.mrb[7].mxu0 }
  0xed   :  { %v1211_v21 = vpop.eup %1210  ;;  %v475_v22 = vmul.f32 %v1209_v18, %v1209_v18  ;;  %v278_v23 = vadd.f32 %v1524_v4, %v277_v20 }
  0xee   :  { %v474_v24 = vmul.f32 %v1211_v21, %v1211_v21  ;;  %1220 = vtanh.f32 %v283_v19 }
  0xef   :  { %1222 = vtanh.f32 %v278_v23  ;;  %v1020_v25 = vpop.f32.mrb[8].mxu0  ;;  %v513_v31 = vsub.f32 1.0, %v475_v22 }
  0xf0   :  { %v1213_v26 = vpop.eup %1212  ;;  %v293_v27 = vadd.f32 %v1020_v25, %v1524_v4  ;;  %v287_v28 = vpop.f32.mrb[9].mxu0  ;;  %v512_v29 = vsub.f32 1.0, %v474_v24 }
  0xf1   :  { %v1215_v30 = vpop.eup %1214  ;;  %v477_v32 = vmul.f32 %v1213_v26, %v1213_v26  ;;  %v288_v33 = vadd.f32 %v1524_v4, %v287_v28 }
  0xf2   :  { %v476_v34 = vmul.f32 %v1215_v30, %v1215_v30  ;;  %1224 = vtanh.f32 %v293_v27  ;;  %1095 = vmatprep.mubr.f32.mxu0 %v512_v29 }
  0xf3   :  { %1226 = vtanh.f32 %v288_v33  ;;  %v1023_v35 = vpop.f32.mrb[10].mxu0  ;;  %1096 = vmatmul.mubr.f32.vlgmr.msra.gmra.mrb[38].mxu0 %v513_v31  ;;  %v515_v43 = vsub.f32 1.0, %v477_v32 }
  0xf4   :  { %v1217_v36 = vpop.eup %1216  ;;  %v303_v37 = vadd.f32 %v1023_v35, %v1524_v4  ;;  %v297_v38 = vpop.f32.mrb[11].mxu0  ;;  %v514_v39 = vsub.f32 1.0, %v476_v34 }
  0xf5   :  { %v1219_v40 = vpop.eup %1218  ;;  %v479_v41 = vmul.f32 %v1217_v36, %v1217_v36  ;;  %v298_v42 = vadd.f32 %v1524_v4, %v297_v38 }
  0xf6   :  { %v478_v44 = vmul.f32 %v1219_v40, %v1219_v40  ;;  %1228 = vtanh.f32 %v303_v37  ;;  %1098 = vmatprep.mubr.f32.mxu0 %v514_v39 }
  0xf7   :  { %1230 = vtanh.f32 %v298_v42  ;;  %v1026_v45 = vpop.f32.mrb[12].mxu0  ;;  %1099 = vmatmul.mubr.f32.gmra.mrb[40].mxu0 %v515_v43  ;;  %v517_v53 = vsub.f32 1.0, %v479_v41 }
  0xf8   :  { %v1221_v46 = vpop.eup %1220  ;;  %v313_v47 = vadd.f32 %v1026_v45, %v1524_v4  ;;  %v307_v48 = vpop.f32.mrb[13].mxu0  ;;  %v516_v49 = vsub.f32 1.0, %v478_v44 }
  0xf9   :  { %v1223_v50 = vpop.eup %1222  ;;  %v481_v51 = vmul.f32 %v1221_v46, %v1221_v46  ;;  %v308_v52 = vadd.f32 %v1524_v4, %v307_v48 }
  0xfa   :  { %1232 = vtanh.f32 %v313_v47  ;;  %1101 = vmatprep.mubr.f32.mxu0 %v516_v49  ;;  %v480_v54 = vmul.f32 %v1223_v50, %v1223_v50 }
  0xfb   :  { %1234 = vtanh.f32 %v308_v52  ;;  %v1029_v55 = vpop.f32.mrb[14].mxu0  ;;  %1102 = vmatmul.mubr.f32.gmra.mrb[42].mxu0 %v517_v53  ;;  %v519_v63 = vsub.f32 1.0, %v481_v51 }
  0xfc   :  { %v1225_v56 = vpop.eup %1224  ;;  %v323_v57 = vadd.f32 %v1029_v55, %v1524_v4  ;;  %v317_v58 = vpop.f32.mrb[15].mxu0  ;;  %v518_v59 = vsub.f32 1.0, %v480_v54 }
  0xfd   :  { %v1227_v60 = vpop.eup %1226  ;;  %v483_v61 = vmul.f32 %v1225_v56, %v1225_v56  ;;  %v318_v62 = vadd.f32 %v1524_v4, %v317_v58 }
  0xfe   :  { %v482_v0 = vmul.f32 %v1227_v60, %v1227_v60  ;;  %1236 = vtanh.f32 %v323_v57  ;;  %1104 = vmatprep.mubr.f32.mxu1 %v518_v59 }
  0xff   :  { %1238 = vtanh.f32 %v318_v62  ;;  %v1032_v1 = vpop.f32.mrb[16].mxu0  ;;  %1105 = vmatmul.mubr.f32.vlgmr.msra.gmra.mrb[0].mxu1 %v519_v63  ;;  %v521_v10 = vsub.f32 1.0, %v483_v61 }
 0x100   :  { %v1229_v2 = vpop.eup %1228  ;;  %v333_v3 = vadd.f32 %v1032_v1, %v1524_v4  ;;  %v327_v5 = vpop.f32.mrb[17].mxu0  ;;  %v520_v6 = vsub.f32 1.0, %v482_v0 }
 0x101   :  { %v1231_v7 = vpop.eup %1230  ;;  %v485_v8 = vmul.f32 %v1229_v2, %v1229_v2  ;;  %v328_v9 = vadd.f32 %v1524_v4, %v327_v5 }
 0x102   :  { %v484_v11 = vmul.f32 %v1231_v7, %v1231_v7  ;;  %1240 = vtanh.f32 %v333_v3  ;;  %1107 = vmatprep.mubr.f32.mxu1 %v520_v6 }
 0x103   :  { %1242 = vtanh.f32 %v328_v9  ;;  %v1035_v12 = vpop.f32.mrb[18].mxu0  ;;  %1108 = vmatmul.mubr.f32.gmra.mrb[2].mxu1 %v521_v10  ;;  %v523_v20 = vsub.f32 1.0, %v485_v8 }
 0x104   :  { %v1233_v13 = vpop.eup %1232  ;;  %v343_v14 = vadd.f32 %v1035_v12, %v1524_v4  ;;  %v337_v15 = vpop.f32.mrb[19].mxu0  ;;  %v522_v16 = vsub.f32 1.0, %v484_v11 }
 0x105   :  { %v1235_v17 = vpop.eup %1234  ;;  %v487_v18 = vmul.f32 %v1233_v13, %v1233_v13  ;;  %v338_v19 = vadd.f32 %v1524_v4, %v337_v15 }
 0x106   :  { %v486_v21 = vmul.f32 %v1235_v17, %v1235_v17  ;;  %1244 = vtanh.f32 %v343_v14  ;;  %1110 = vmatprep.mubr.f32.mxu1 %v522_v16 }
 0x107   :  { %1246 = vtanh.f32 %v338_v19  ;;  %v1038_v22 = vpop.f32.mrb[20].mxu0  ;;  %1111 = vmatmul.mubr.f32.gmra.mrb[4].mxu1 %v523_v20  ;;  %v525_v30 = vsub.f32 1.0, %v487_v18 }
 0x108   :  { %v1237_v23 = vpop.eup %1236  ;;  %v353_v24 = vadd.f32 %v1038_v22, %v1524_v4  ;;  %v347_v25 = vpop.f32.mrb[21].mxu0  ;;  %v524_v26 = vsub.f32 1.0, %v486_v21 }
 0x109   :  { %v1239_v27 = vpop.eup %1238  ;;  %v489_v28 = vmul.f32 %v1237_v23, %v1237_v23  ;;  %v348_v29 = vadd.f32 %v1524_v4, %v347_v25 }
 0x10a   :  { %v488_v31 = vmul.f32 %v1239_v27, %v1239_v27  ;;  %1248 = vtanh.f32 %v353_v24  ;;  %1113 = vmatprep.mubr.f32.mxu1 %v524_v26 }
 0x10b   :  { %1250 = vtanh.f32 %v348_v29  ;;  %v1041_v32 = vpop.f32.mrb[22].mxu0  ;;  %1114 = vmatmul.mubr.f32.gmra.mrb[6].mxu1 %v525_v30  ;;  %v527_v40 = vsub.f32 1.0, %v489_v28 }
 0x10c   :  { %v1241_v33 = vpop.eup %1240  ;;  %v363_v34 = vadd.f32 %v1041_v32, %v1524_v4  ;;  %v357_v35 = vpop.f32.mrb[23].mxu0  ;;  %v526_v36 = vsub.f32 1.0, %v488_v31 }
 0x10d   :  { %v1243_v37 = vpop.eup %1242  ;;  %v491_v38 = vmul.f32 %v1241_v33, %v1241_v33  ;;  %v358_v39 = vadd.f32 %v1524_v4, %v357_v35 }
 0x10e   :  { %v490_v41 = vmul.f32 %v1243_v37, %v1243_v37  ;;  %1252 = vtanh.f32 %v363_v34  ;;  %1116 = vmatprep.mubr.f32.mxu1 %v526_v36 }
 0x10f   :  { %1254 = vtanh.f32 %v358_v39  ;;  %v1044_v42 = vpop.f32.mrb[24].mxu0  ;;  %1117 = vmatmul.mubr.f32.gmra.mrb[8].mxu1 %v527_v40  ;;  %v529_v50 = vsub.f32 1.0, %v491_v38 }
 0x110   :  { %v1245_v43 = vpop.eup %1244  ;;  %v373_v44 = vadd.f32 %v1044_v42, %v1524_v4  ;;  %v367_v45 = vpop.f32.mrb[25].mxu0  ;;  %v528_v46 = vsub.f32 1.0, %v490_v41 }
 0x111   :  { %v1247_v47 = vpop.eup %1246  ;;  %v493_v48 = vmul.f32 %v1245_v43, %v1245_v43  ;;  %v368_v49 = vadd.f32 %v1524_v4, %v367_v45 }
 0x112   :  { %v492_v51 = vmul.f32 %v1247_v47, %v1247_v47  ;;  %1256 = vtanh.f32 %v373_v44  ;;  %1119 = vmatprep.mubr.f32.mxu1 %v528_v46 }
 0x113   :  { %1258 = vtanh.f32 %v368_v49  ;;  %v1047_v52 = vpop.f32.mrb[26].mxu0  ;;  %1120 = vmatmul.mubr.f32.gmra.mrb[10].mxu1 %v529_v50  ;;  %v531_v60 = vsub.f32 1.0, %v493_v48 }
 0x114   :  { %v1249_v53 = vpop.eup %1248  ;;  %v383_v54 = vadd.f32 %v1047_v52, %v1524_v4  ;;  %v377_v55 = vpop.f32.mrb[27].mxu0  ;;  %v530_v56 = vsub.f32 1.0, %v492_v51 }
 0x115   :  { %v1251_v57 = vpop.eup %1250  ;;  %v495_v58 = vmul.f32 %v1249_v53, %v1249_v53  ;;  %v378_v59 = vadd.f32 %v1524_v4, %v377_v55 }
 0x116   :  { %v494_v61 = vmul.f32 %v1251_v57, %v1251_v57  ;;  %1260 = vtanh.f32 %v383_v54  ;;  %1122 = vmatprep.mubr.f32.mxu1 %v530_v56 }
 0x117   :  { %1262 = vtanh.f32 %v378_v59  ;;  %v1050_v62 = vpop.f32.mrb[28].mxu0  ;;  %1123 = vmatmul.mubr.f32.gmra.mrb[12].mxu1 %v531_v60  ;;  %v533_v7 = vsub.f32 1.0, %v495_v58 }
 0x118   :  { %v1253_v63 = vpop.eup %1252  ;;  %v393_v0 = vadd.f32 %v1050_v62, %v1524_v4  ;;  %v387_v1 = vpop.f32.mrb[29].mxu0  ;;  %v532_v2 = vsub.f32 1.0, %v494_v61 }
 0x119   :  { %v1255_v3 = vpop.eup %1254  ;;  %v497_v5 = vmul.f32 %v1253_v63, %v1253_v63  ;;  %v388_v6 = vadd.f32 %v1524_v4, %v387_v1 }
 0x11a   :  { %v496_v8 = vmul.f32 %v1255_v3, %v1255_v3  ;;  %1264 = vtanh.f32 %v393_v0  ;;  %1125 = vmatprep.mubr.f32.mxu1 %v532_v2 }
 0x11b   :  { %1266 = vtanh.f32 %v388_v6  ;;  %v1053_v9 = vpop.f32.mrb[30].mxu0  ;;  %1126 = vmatmul.mubr.f32.gmra.mrb[14].mxu1 %v533_v7  ;;  %v535_v17 = vsub.f32 1.0, %v497_v5 }
 0x11c   :  { %v1257_v10 = vpop.eup %1256  ;;  %v403_v11 = vadd.f32 %v1053_v9, %v1524_v4  ;;  %v397_v12 = vpop.f32.mrb[31].mxu0  ;;  %v534_v13 = vsub.f32 1.0, %v496_v8 }
 0x11d   :  { %v1259_v14 = vpop.eup %1258  ;;  %v499_v15 = vmul.f32 %v1257_v10, %v1257_v10  ;;  %v398_v16 = vadd.f32 %v1524_v4, %v397_v12 }
 0x11e   :  { %v498_v18 = vmul.f32 %v1259_v14, %v1259_v14  ;;  %1268 = vtanh.f32 %v403_v11  ;;  %1128 = vmatprep.mubr.f32.mxu1 %v534_v13 }
 0x11f   :  { %1270 = vtanh.f32 %v398_v16  ;;  %v1056_v19 = vpop.f32.mrb[32].mxu0  ;;  %1129 = vmatmul.mubr.f32.gmra.mrb[16].mxu1 %v535_v17  ;;  %v537_v27 = vsub.f32 1.0, %v499_v15 }
 0x120   :  { %v1261_v20 = vpop.eup %1260  ;;  %v413_v21 = vadd.f32 %v1056_v19, %v1524_v4  ;;  %v407_v22 = vpop.f32.mrb[33].mxu0  ;;  %v536_v23 = vsub.f32 1.0, %v498_v18 }
 0x121   :  { %v1263_v24 = vpop.eup %1262  ;;  %v501_v25 = vmul.f32 %v1261_v20, %v1261_v20  ;;  %v408_v26 = vadd.f32 %v1524_v4, %v407_v22 }
 0x122   :  { %v500_v28 = vmul.f32 %v1263_v24, %v1263_v24  ;;  %1272 = vtanh.f32 %v413_v21  ;;  %1131 = vmatprep.mubr.f32.mxu1 %v536_v23 }
 0x123   :  { %1274 = vtanh.f32 %v408_v26  ;;  %v1059_v29 = vpop.f32.mrb[34].mxu0  ;;  %1132 = vmatmul.mubr.f32.gmra.mrb[18].mxu1 %v537_v27  ;;  %v539_v37 = vsub.f32 1.0, %v501_v25 }
 0x124   :  { %v1265_v30 = vpop.eup %1264  ;;  %v423_v31 = vadd.f32 %v1059_v29, %v1524_v4  ;;  %v417_v32 = vpop.f32.mrb[35].mxu0  ;;  %v538_v33 = vsub.f32 1.0, %v500_v28 }
 0x125   :  { %v1267_v34 = vpop.eup %1266  ;;  %v503_v35 = vmul.f32 %v1265_v30, %v1265_v30  ;;  %v418_v36 = vadd.f32 %v1524_v4, %v417_v32 }
 0x126   :  { %v502_v38 = vmul.f32 %v1267_v34, %v1267_v34  ;;  %1276 = vtanh.f32 %v423_v31  ;;  %1134 = vmatprep.mubr.f32.mxu1 %v538_v33 }
 0x127   :  { %1278 = vtanh.f32 %v418_v36  ;;  %v1062_v39 = vpop.f32.mrb[36].mxu0  ;;  %1135 = vmatmul.mubr.f32.gmra.mrb[20].mxu1 %v539_v37  ;;  %v541_v47 = vsub.f32 1.0, %v503_v35 }
 0x128   :  { %v1269_v40 = vpop.eup %1268  ;;  %v433_v41 = vadd.f32 %v1062_v39, %v1524_v4  ;;  %v427_v42 = vpop.f32.mrb[37].mxu0  ;;  %v540_v43 = vsub.f32 1.0, %v502_v38 }
 0x129   :  { %v1271_v44 = vpop.eup %1270  ;;  %v505_v45 = vmul.f32 %v1269_v40, %v1269_v40  ;;  %v428_v46 = vadd.f32 %v1524_v4, %v427_v42 }
 0x12a   :  { %v504_v48 = vmul.f32 %v1271_v44, %v1271_v44  ;;  %1280 = vtanh.f32 %v433_v41  ;;  %1137 = vmatprep.mubr.f32.mxu1 %v540_v43 }
 0x12b   :  { %1282 = vtanh.f32 %v428_v46  ;;  %1138 = vmatmul.mubr.f32.gmra.mrb[22].mxu1 %v541_v47  ;;  %v543_v53 = vsub.f32 1.0, %v505_v45 }
 0x12c   :  { %v1273_v49 = vpop.eup %1272  ;;  %v542_v50 = vsub.f32 1.0, %v504_v48 }
 0x12d   :  { %v1275_v51 = vpop.eup %1274  ;;  %v507_v52 = vmul.f32 %v1273_v49, %v1273_v49 }
 0x12e   :  { %v506_v54 = vmul.f32 %v1275_v51, %v1275_v51  ;;  %1140 = vmatprep.mubr.f32.mxu1 %v542_v50 }
 0x12f   :  { %1141 = vmatmul.mubr.f32.gmra.mrb[24].mxu1 %v543_v53  ;;  %v545_v59 = vsub.f32 1.0, %v507_v52 }
 0x130   :  { %v1277_v55 = vpop.eup %1276  ;;  %v544_v56 = vsub.f32 1.0, %v506_v54 }
 0x131   :  { %v1279_v57 = vpop.eup %1278  ;;  %v509_v58 = vmul.f32 %v1277_v55, %v1277_v55 }
 0x132   :  { %v508_v4 = vmul.f32 %v1279_v57, %v1279_v57  ;;  %1143 = vmatprep.mubr.f32.mxu1 %v544_v56 }
 0x133   :  { %1144 = vmatmul.mubr.f32.gmra.mrb[26].mxu1 %v545_v59  ;;  %v547_v0 = vsub.f32 1.0, %v509_v58 }
 0x134   :  { %v1281_v60 = vpop.eup %1280  ;;  %v546_v61 = vsub.f32 1.0, %v508_v4 }
 0x135   :  { %v1283_v62 = vpop.eup %1282  ;;  %v511_v63 = vmul.f32 %v1281_v60, %v1281_v60 }
 0x136   :  { %v510_v1 = vmul.f32 %v1283_v62, %v1283_v62  ;;  %1146 = vmatprep.mubr.f32.mxu1 %v546_v61 }
 0x137   :  { %1147 = vmatmul.mubr.f32.gmra.mrb[28].mxu1 %v547_v0  ;;  %v549_v3 = vsub.f32 1.0, %v511_v63 }
 0x138   :  { %v548_v2 = vsub.f32 1.0, %v510_v1 }
 0x13a   :  { %1149 = vmatprep.mubr.f32.mxu1 %v548_v2 }
 0x13b   :  { %1150 = vmatmul.mubr.f32.gmra.mrb[30].mxu1 %v549_v3 }
 0x1c6   :  { %v1097_v5 = vpop.f32.mrb[38].mxu0 }
 0x1c7   :  { %822 = vst.msk [vmem:[%s1720_s4 + $0x8] sm:$0xff] %vm66_vm0, %v1097_v5  ;;  %v632_v6 = vpop.f32.mrb[39].mxu0 }
 0x1c8   :  { %821 = vst.msk [vmem:[%s1720_s4] sm:$0xff] %vm66_vm0, %v632_v6 }
 0x1ca   :  { %v1100_v7 = vpop.f32.mrb[40].mxu0 }
 0x1cb   :  { %824 = vst.msk [vmem:[%s1720_s4 + $0x18] sm:$0xff] %vm66_vm0, %v1100_v7  ;;  %v642_v8 = vpop.f32.mrb[41].mxu0 }
 0x1cc   :  { %823 = vst.msk [vmem:[%s1720_s4 + $0x10] sm:$0xff] %vm66_vm0, %v642_v8 }
 0x1ce   :  { %v1103_v9 = vpop.f32.mrb[42].mxu0 }
 0x1cf   :  { %826 = vst.msk [vmem:[%s1720_s4 + $0x28] sm:$0xff] %vm66_vm0, %v1103_v9  ;;  %v652_v10 = vpop.f32.mrb[43].mxu0 }
 0x1d0   :  { %825 = vst.msk [vmem:[%s1720_s4 + $0x20] sm:$0xff] %vm66_vm0, %v652_v10 }
 0x1d2   :  { %v1106_v11 = vpop.f32.mrb[0].mxu1 }
 0x1d3   :  { %828 = vst.msk [vmem:[%s1720_s4 + $0x38] sm:$0xff] %vm66_vm0, %v1106_v11  ;;  %v662_v12 = vpop.f32.mrb[1].mxu1 }
 0x1d4   :  { %827 = vst.msk [vmem:[%s1720_s4 + $0x30] sm:$0xff] %vm66_vm0, %v662_v12 }
 0x1d6   :  { %v1109_v13 = vpop.f32.mrb[2].mxu1 }
 0x1d7   :  { %830 = vst.msk [vmem:[%s1720_s4 + $0x48] sm:$0xff] %vm66_vm0, %v1109_v13  ;;  %v672_v14 = vpop.f32.mrb[3].mxu1 }
 0x1d8   :  { %829 = vst.msk [vmem:[%s1720_s4 + $0x40] sm:$0xff] %vm66_vm0, %v672_v14 }
 0x1da   :  { %v1112_v15 = vpop.f32.mrb[4].mxu1 }
 0x1db   :  { %832 = vst.msk [vmem:[%s1720_s4 + $0x58] sm:$0xff] %vm66_vm0, %v1112_v15  ;;  %v682_v16 = vpop.f32.mrb[5].mxu1 }
 0x1dc   :  { %831 = vst.msk [vmem:[%s1720_s4 + $0x50] sm:$0xff] %vm66_vm0, %v682_v16 }
 0x1de   :  { %v1115_v17 = vpop.f32.mrb[6].mxu1 }
 0x1df   :  { %834 = vst.msk [vmem:[%s1720_s4 + $0x68] sm:$0xff] %vm66_vm0, %v1115_v17  ;;  %v692_v18 = vpop.f32.mrb[7].mxu1 }
 0x1e0   :  { %833 = vst.msk [vmem:[%s1720_s4 + $0x60] sm:$0xff] %vm66_vm0, %v692_v18 }
 0x1e2   :  { %v1118_v19 = vpop.f32.mrb[8].mxu1 }
 0x1e3   :  { %836 = vst.msk [vmem:[%s1720_s4 + $0x78] sm:$0xff] %vm66_vm0, %v1118_v19  ;;  %v702_v20 = vpop.f32.mrb[9].mxu1 }
 0x1e4   :  { %835 = vst.msk [vmem:[%s1720_s4 + $0x70] sm:$0xff] %vm66_vm0, %v702_v20 }
 0x1e6   :  { %v1121_v21 = vpop.f32.mrb[10].mxu1 }
 0x1e7   :  { %838 = vst.msk [vmem:[%s1720_s4 + $0x88] sm:$0xff] %vm66_vm0, %v1121_v21  ;;  %v712_v22 = vpop.f32.mrb[11].mxu1 }
 0x1e8   :  { %837 = vst.msk [vmem:[%s1720_s4 + $0x80] sm:$0xff] %vm66_vm0, %v712_v22 }
 0x1ea   :  { %v1124_v23 = vpop.f32.mrb[12].mxu1 }
 0x1eb   :  { %840 = vst.msk [vmem:[%s1720_s4 + $0x98] sm:$0xff] %vm66_vm0, %v1124_v23  ;;  %v722_v24 = vpop.f32.mrb[13].mxu1 }
 0x1ec   :  { %839 = vst.msk [vmem:[%s1720_s4 + $0x90] sm:$0xff] %vm66_vm0, %v722_v24 }
 0x1ee   :  { %v1127_v25 = vpop.f32.mrb[14].mxu1 }
 0x1ef   :  { %842 = vst.msk [vmem:[%s1720_s4 + $0xa8] sm:$0xff] %vm66_vm0, %v1127_v25  ;;  %v732_v26 = vpop.f32.mrb[15].mxu1 }
 0x1f0   :  { %841 = vst.msk [vmem:[%s1720_s4 + $0xa0] sm:$0xff] %vm66_vm0, %v732_v26 }
 0x1f2   :  { %v1130_v27 = vpop.f32.mrb[16].mxu1 }
 0x1f3   :  { %844 = vst.msk [vmem:[%s1720_s4 + $0xb8] sm:$0xff] %vm66_vm0, %v1130_v27  ;;  %v742_v28 = vpop.f32.mrb[17].mxu1 }
 0x1f4   :  { %843 = vst.msk [vmem:[%s1720_s4 + $0xb0] sm:$0xff] %vm66_vm0, %v742_v28 }
 0x1f6   :  { %v1133_v29 = vpop.f32.mrb[18].mxu1 }
 0x1f7   :  { %846 = vst.msk [vmem:[%s1720_s4 + $0xc8] sm:$0xff] %vm66_vm0, %v1133_v29  ;;  %v752_v30 = vpop.f32.mrb[19].mxu1 }
 0x1f8   :  { %845 = vst.msk [vmem:[%s1720_s4 + $0xc0] sm:$0xff] %vm66_vm0, %v752_v30 }
 0x1fa   :  { %v1136_v31 = vpop.f32.mrb[20].mxu1 }
 0x1fb   :  { %848 = vst.msk [vmem:[%s1720_s4 + $0xd8] sm:$0xff] %vm66_vm0, %v1136_v31  ;;  %v762_v32 = vpop.f32.mrb[21].mxu1 }
 0x1fc   :  { %847 = vst.msk [vmem:[%s1720_s4 + $0xd0] sm:$0xff] %vm66_vm0, %v762_v32 }
 0x1fe   :  { %v1139_v33 = vpop.f32.mrb[22].mxu1 }
 0x1ff   :  { %850 = vst.msk [vmem:[%s1720_s4 + $0xe8] sm:$0xff] %vm66_vm0, %v1139_v33  ;;  %v772_v34 = vpop.f32.mrb[23].mxu1 }
 0x200   :  { %849 = vst.msk [vmem:[%s1720_s4 + $0xe0] sm:$0xff] %vm66_vm0, %v772_v34 }
 0x202   :  { %v1142_v35 = vpop.f32.mrb[24].mxu1 }
 0x203   :  { %852 = vst.msk [vmem:[%s1720_s4 + $0xf8] sm:$0xff] %vm66_vm0, %v1142_v35  ;;  %v782_v36 = vpop.f32.mrb[25].mxu1 }
 0x204   :  { %851 = vst.msk [vmem:[%s1720_s4 + $0xf0] sm:$0xff] %vm66_vm0, %v782_v36 }
 0x206   :  { %v1145_v37 = vpop.f32.mrb[26].mxu1 }
 0x207   :  { %854 = vst.msk [vmem:[%s1720_s4 + $0x108] sm:$0xff] %vm66_vm0, %v1145_v37  ;;  %v792_v38 = vpop.f32.mrb[27].mxu1 }
 0x208   :  { %853 = vst.msk [vmem:[%s1720_s4 + $0x100] sm:$0xff] %vm66_vm0, %v792_v38 }
 0x20a   :  { %v1148_v39 = vpop.f32.mrb[28].mxu1 }
 0x20b   :  { %856 = vst.msk [vmem:[%s1720_s4 + $0x118] sm:$0xff] %vm66_vm0, %v1148_v39  ;;  %v802_v40 = vpop.f32.mrb[29].mxu1 }
 0x20c   :  { %855 = vst.msk [vmem:[%s1720_s4 + $0x110] sm:$0xff] %vm66_vm0, %v802_v40 }
 0x20e   :  { %v1151_v41 = vpop.f32.mrb[30].mxu1 }
 0x20f   :  { %858 = vst.msk [vmem:[%s1720_s4 + $0x128] sm:$0xff] %vm66_vm0, %v1151_v41  ;;  %v812_v42 = vpop.f32.mrb[31].mxu1 }
 0x210   :  { %857 = vst.msk [vmem:[%s1720_s4 + $0x120] sm:$0xff] %vm66_vm0, %v812_v42 }

</bundles_post_ra>
